<compile_context>
chip_gen: v7x
topology: tpu7x:2x2x1
jax: 0.10.0
libtpu: 0.0.40
codegen_flags: <defaults>
</compile_context>

<pallas_src>
import functools

import jax
import jax.numpy as jnp
from jax.experimental import pallas as pl
from jax.experimental.pallas import tpu as pltpu

_LANE = 128                      # lane width (last dim)
_MAX_BATCH_TILE = 512            # rows per grid step for large batches
_VMEM_CAP_BYTES = 64 * 1024 * 1024   # v7x physical VMEM (safe on v5e/v6e too)


def _round_up(x: int, m: int) -> int:
    return ((x + m - 1) // m) * m


def _min_sublane(dtype) -> int:
    """Minimum sublane tile for a dtype (8 for 4-byte, 16 for 2-byte, 32 for 1-byte)."""
    itemsize = jnp.dtype(dtype).itemsize
    return {4: 8, 2: 16, 1: 32}.get(itemsize, 8)


# --------------------------------- kernel -----------------------------------

def _mlp_kernel(*refs, num_layers: int):
    """Fused MLP: refs = (x_ref, w0, b0, ..., w_{L-1}, b_{L-1}, o_ref).

    x_ref: (TB, D0_pad) f32; w_i: (Di_pad, Di+1_pad) bf16; b_i: (1, Di+1_pad) f32.
    tanh after every layer except the last (output) layer.
    """
    x_ref = refs[0]
    o_ref = refs[-1]
    param_refs = refs[1:-1]

    h = x_ref[...]                                   # f32 activations
    for i in range(num_layers):
        w = param_refs[2 * i][...]                   # bf16 weights (MXU-native)
        b = param_refs[2 * i + 1][...]               # f32 bias
        h = jnp.dot(h.astype(jnp.bfloat16), w,
                    preferred_element_type=jnp.float32) + b
        if i < num_layers - 1:
            h = jnp.tanh(h)                          # f32 EUP tanh
    o_ref[...] = h.astype(o_ref.dtype)


# -------------------------------- forward -----------------------------------

def _vmem_bytes_estimate(tb, padded_params, x_itemsize):
    """Rough VMEM footprint: double-buffered streamed tiles + resident params
    (counted x2 for the pipeliner's buffering) + activation headroom."""
    d0 = padded_params[0][0].shape[0]
    dl = padded_params[-1][0].shape[1]
    total = 2 * tb * d0 * x_itemsize          # x tile, double-buffered
    total += 2 * tb * dl * x_itemsize         # out tile, double-buffered
    for w, b in padded_params:
        total += 2 * (w.size * w.dtype.itemsize + b.size * b.dtype.itemsize)
    max_d = max(max(w.shape[0], w.shape[1]) for w, _ in padded_params)
    total += 4 * tb * max_d * 4               # intermediate activations (f32 + bf16 copies)
    return total


def _linears_forward_impl(padded_params, x, out_features):
    """padded_params: list of (w_pad bf16 (Din_pad, Dout_pad), b_pad f32 (1, Dout_pad))."""
    B, Din = x.shape
    num_layers = len(padded_params)
    Din_pad = padded_params[0][0].shape[0]
    Dout_pad = padded_params[-1][0].shape[1]

    sub = _min_sublane(x.dtype)
    # Batch tile: largest sublane-aligned tile up to _MAX_BATCH_TILE.
    tb = _MAX_BATCH_TILE if B >= _MAX_BATCH_TILE else _round_up(B, sub)
    B_pad = _round_up(B, tb)
    nb = B_pad // tb

    # Zero-pad x to a lane/sublane aligned slab (padded rows/cols stay 0
    # through orthogonal-zero-padded weights, bias=0 and tanh).
    x_pad = jnp.zeros((B_pad, Din_pad), x.dtype).at[:B, :Din].set(x)

    flat = []
    for w, b in padded_params:
        flat.append(w)
        flat.append(b)

    # Resident weight/bias blocks: same (0, 0) block for every grid step.
    param_specs = []
    for w, b in padded_params:
        param_specs.append(pl.BlockSpec(w.shape, lambda i: (0, 0)))
        param_specs.append(pl.BlockSpec(b.shape, lambda i: (0, 0)))

    vmem_limit = min(
        _VMEM_CAP_BYTES,
        max(16 * 1024 * 1024,
            _vmem_bytes_estimate(tb, padded_params, jnp.dtype(x.dtype).itemsize)
            + 4 * 1024 * 1024),
    )

    kernel = functools.partial(_mlp_kernel, num_layers=num_layers)
    y_pad = pl.pallas_call(
        kernel,
        out_shape=jax.ShapeDtypeStruct((B_pad, Dout_pad), x.dtype),
        grid=(nb,),
        in_specs=[pl.BlockSpec((tb, Din_pad), lambda i: (i, 0))] + param_specs,
        out_specs=pl.BlockSpec((tb, Dout_pad), lambda i: (i, 0)),
        compiler_params=pltpu.CompilerParams(
            dimension_semantics=("parallel",),
            vmem_limit_bytes=int(vmem_limit),
        ),
    )(x_pad, *flat)

    return y_pad[:B, :out_features]


# jit the whole forward (single dispatch, no per-call Python overhead)
linears_forward = jax.jit(_linears_forward_impl, static_argnums=(2,))


# ------------------------- parameter initialization -------------------------

def _orthogonal(key, out_features, in_features, dtype=jnp.float32):
    """Orthogonal init matching torch.nn.init.orthogonal_ semantics
    (returns a (out_features, in_features) matrix with orthonormal rows/cols)."""
    rows, cols = out_features, in_features
    flat = jax.random.normal(key, (max(rows, cols), min(rows, cols)), dtype)
    q, r = jnp.linalg.qr(flat)
    d = jnp.diag(r)
    d = jnp.where(d == 0, jnp.ones_like(d), jnp.sign(d))  # sign fix, no zeroed cols
    q = q * d[None, :]
    if rows < cols:
        q = q.T
    return q[:rows, :cols].astype(dtype)


def init_linears_params(key, in_features, hiddens, out_features, dtype=jnp.float32):
    """Unpadded params for Linears(in_features, out_features, hiddens, bias=True).

    Returns list of (w (din, dout), b (dout,)) with w stored transposed
    relative to PyTorch so the kernel computes y = x @ w + b.
    """
    in_dims = [in_features] + list(hiddens[:-1])
    out_dims = list(hiddens)
    layer_dims = list(zip(in_dims, out_dims)) + [(hiddens[-1], out_features)]
    params = []
    for li, (din, dout) in enumerate(layer_dims):
        kw, kb = jax.random.split(jax.random.fold_in(key, li))
        w_pt = _orthogonal(kw, dout, din, dtype)       # PyTorch layout (out, in)
        bound = 1.0 / (din ** 0.5)                     # PyTorch default bias init
        bias = jax.random.uniform(kb, (dout,), dtype, minval=-bound, maxval=bound)
        params.append((w_pt.T, bias))                  # stored as (in, out)
    return params


def pad_params_for_tpu(params, weight_dtype=jnp.bfloat16):
    """Zero-pad weights/biases to 128-lane multiples.

    Weights are stored in bf16 (MXU-native operand dtype; accumulation stays
    f32 inside the kernel).  Biases stay f32, shaped (1, Dout_pad).  Padded
    rows/cols are zero so padded feature columns remain exactly 0 through the
    bias add and tanh.
    """
    padded = []
    for w, b in params:
        din, dout = w.shape
        din_p = _round_up(din, _LANE)
        dout_p = _round_up(dout, _LANE)
        w_p = jnp.zeros((din_p, dout_p), weight_dtype).at[:din, :dout].set(
            w.astype(weight_dtype))
        b_p = jnp.zeros((1, dout_p), b.dtype).at[0, :dout].set(b)
        padded.append((w_p, b_p))
    return padded


# ----------------------------------- main ------------------------------------

if __name__ == "__main__":
    key = jax.random.PRNGKey(0)

    batch = 8
    in_features = 32
    hiddens = [64, 48]
    out_features = 16

    kx, kp = jax.random.split(key)
    x = jax.random.normal(kx, (batch, in_features), jnp.float32)

    params = init_linears_params(kp, in_features, hiddens, out_features)
    padded_params = pad_params_for_tpu(params)

    y = linears_forward(padded_params, x, out_features)
    y = jax.block_until_ready(y)

    # sanity: compare against plain-JAX f32 reference using the UNPADDED params
    # (kernel uses bf16 MXU operands with f32 accumulation -> looser tolerance)
    h_ref = x
    for i, (w, b) in enumerate(params):
        h_ref = h_ref @ w + b
        if i < len(params) - 1:
            h_ref = jnp.tanh(h_ref)

    assert y.shape == (batch, out_features)
    assert jnp.allclose(y, h_ref, atol=5e-2, rtol=5e-2), (
        f"max abs err {jnp.max(jnp.abs(y - h_ref))}")

    print("KERNEL_OK")
</pallas_src>

<mosaic_0001>
module attributes {stable_mosaic.version = 11 : i64} {
  func.func @_mlp_kernel(%arg0: i32, %arg1: memref<8x128xf32, #tpu.memory_space<vmem>>, %arg2: memref<128x128xbf16, #tpu.memory_space<vmem>>, %arg3: memref<1x128xf32, #tpu.memory_space<vmem>>, %arg4: memref<128x128xbf16, #tpu.memory_space<vmem>>, %arg5: memref<1x128xf32, #tpu.memory_space<vmem>>, %arg6: memref<128x128xbf16, #tpu.memory_space<vmem>>, %arg7: memref<1x128xf32, #tpu.memory_space<vmem>>, %arg8: memref<8x128xf32, #tpu.memory_space<vmem>>) attributes {dimension_semantics = [#tpu.dimension_semantics<parallel>], iteration_bounds = array<i64: 1>, scalar_prefetch = 0 : i64, scratch_operands = 0 : i64, tpu.core_type = #tpu.core_type<tc>, window_params = [{transform_indices = @transform_0, window_bounds = array<i64: 8, 128>}, {pipeline_mode = #tpu.pipeline_mode<synchronous>, transform_indices = @transform_1, window_bounds = array<i64: 128, 128>}, {pipeline_mode = #tpu.pipeline_mode<synchronous>, transform_indices = @transform_2, window_bounds = array<i64: 1, 128>}, {pipeline_mode = #tpu.pipeline_mode<synchronous>, transform_indices = @transform_3, window_bounds = array<i64: 128, 128>}, {pipeline_mode = #tpu.pipeline_mode<synchronous>, transform_indices = @transform_4, window_bounds = array<i64: 1, 128>}, {pipeline_mode = #tpu.pipeline_mode<synchronous>, transform_indices = @transform_5, window_bounds = array<i64: 128, 128>}, {pipeline_mode = #tpu.pipeline_mode<synchronous>, transform_indices = @transform_6, window_bounds = array<i64: 1, 128>}, {transform_indices = @transform_7, window_bounds = array<i64: 8, 128>}]} {
    %c0 = arith.constant 0 : index
    %c0_0 = arith.constant 0 : index
    %0 = vector.load %arg1[%c0, %c0_0] : memref<8x128xf32, #tpu.memory_space<vmem>>, vector<8x128xf32>
    %c0_1 = arith.constant 0 : index
    %c0_2 = arith.constant 0 : index
    %1 = vector.load %arg2[%c0_1, %c0_2] : memref<128x128xbf16, #tpu.memory_space<vmem>>, vector<128x128xbf16>
    %c0_3 = arith.constant 0 : index
    %c0_4 = arith.constant 0 : index
    %2 = vector.load %arg3[%c0_3, %c0_4] : memref<1x128xf32, #tpu.memory_space<vmem>>, vector<1x128xf32>
    %3 = arith.truncf %0 : vector<8x128xf32> to vector<8x128xbf16>
    %cst = arith.constant dense<0.000000e+00> : vector<8x128xf32>
    %4 = tpu.matmul %3, %1, %cst {dimension_numbers = #tpu.dot_dimension_numbers<[1], [0], [0], [1], [0, 0, 1, 1], [], []>} : vector<8x128xbf16>, vector<128x128xbf16>, vector<8x128xf32> -> vector<8x128xf32>
    %5 = vector.broadcast %2 : vector<1x128xf32> to vector<8x128xf32>
    %6 = arith.addf %4, %5 : vector<8x128xf32>
    %7 = math.tanh %6 : vector<8x128xf32>
    %c0_5 = arith.constant 0 : index
    %c0_6 = arith.constant 0 : index
    %8 = vector.load %arg4[%c0_5, %c0_6] : memref<128x128xbf16, #tpu.memory_space<vmem>>, vector<128x128xbf16>
    %c0_7 = arith.constant 0 : index
    %c0_8 = arith.constant 0 : index
    %9 = vector.load %arg5[%c0_7, %c0_8] : memref<1x128xf32, #tpu.memory_space<vmem>>, vector<1x128xf32>
    %10 = arith.truncf %7 : vector<8x128xf32> to vector<8x128xbf16>
    %cst_9 = arith.constant dense<0.000000e+00> : vector<8x128xf32>
    %11 = tpu.matmul %10, %8, %cst_9 {dimension_numbers = #tpu.dot_dimension_numbers<[1], [0], [0], [1], [0, 0, 1, 1], [], []>} : vector<8x128xbf16>, vector<128x128xbf16>, vector<8x128xf32> -> vector<8x128xf32>
    %12 = vector.broadcast %9 : vector<1x128xf32> to vector<8x128xf32>
    %13 = arith.addf %11, %12 : vector<8x128xf32>
    %14 = math.tanh %13 : vector<8x128xf32>
    %c0_10 = arith.constant 0 : index
    %c0_11 = arith.constant 0 : index
    %15 = vector.load %arg6[%c0_10, %c0_11] : memref<128x128xbf16, #tpu.memory_space<vmem>>, vector<128x128xbf16>
    %c0_12 = arith.constant 0 : index
    %c0_13 = arith.constant 0 : index
    %16 = vector.load %arg7[%c0_12, %c0_13] : memref<1x128xf32, #tpu.memory_space<vmem>>, vector<1x128xf32>
    %17 = arith.truncf %14 : vector<8x128xf32> to vector<8x128xbf16>
    %cst_14 = arith.constant dense<0.000000e+00> : vector<8x128xf32>
    %18 = tpu.matmul %17, %15, %cst_14 {dimension_numbers = #tpu.dot_dimension_numbers<[1], [0], [0], [1], [0, 0, 1, 1], [], []>} : vector<8x128xbf16>, vector<128x128xbf16>, vector<8x128xf32> -> vector<8x128xf32>
    %19 = vector.broadcast %16 : vector<1x128xf32> to vector<8x128xf32>
    %20 = arith.addf %18, %19 : vector<8x128xf32>
    %c0_15 = arith.constant 0 : index
    %c0_16 = arith.constant 0 : index
    %21 = vector.load %arg8[%c0_15, %c0_16] : memref<8x128xf32, #tpu.memory_space<vmem>>, vector<8x128xf32>
    tpu.vector_store %arg8[%c0_15, %c0_16], %20 {strides = array<i32>} : memref<8x128xf32, #tpu.memory_space<vmem>>, vector<8x128xf32>,
    return
  }
  func.func @transform_0(%arg0: i32) -> (i32, i32) {
    %c0_i32 = arith.constant 0 : i32
    %c0_i32_0 = arith.constant 0 : i32
    return %arg0, %c0_i32 : i32, i32
  }
  func.func @transform_1(%arg0: i32) -> (i32, i32) {
    %c0_i32 = arith.constant 0 : i32
    %c0_i32_0 = arith.constant 0 : i32
    %c0_i32_1 = arith.constant 0 : i32
    return %c0_i32, %c0_i32_0 : i32, i32
  }
  func.func @transform_2(%arg0: i32) -> (i32, i32) {
    %c0_i32 = arith.constant 0 : i32
    %c0_i32_0 = arith.constant 0 : i32
    %c0_i32_1 = arith.constant 0 : i32
    return %c0_i32, %c0_i32_0 : i32, i32
  }
  func.func @transform_3(%arg0: i32) -> (i32, i32) {
    %c0_i32 = arith.constant 0 : i32
    %c0_i32_0 = arith.constant 0 : i32
    %c0_i32_1 = arith.constant 0 : i32
    return %c0_i32, %c0_i32_0 : i32, i32
  }
  func.func @transform_4(%arg0: i32) -> (i32, i32) {
    %c0_i32 = arith.constant 0 : i32
    %c0_i32_0 = arith.constant 0 : i32
    %c0_i32_1 = arith.constant 0 : i32
    return %c0_i32, %c0_i32_0 : i32, i32
  }
  func.func @transform_5(%arg0: i32) -> (i32, i32) {
    %c0_i32 = arith.constant 0 : i32
    %c0_i32_0 = arith.constant 0 : i32
    %c0_i32_1 = arith.constant 0 : i32
    return %c0_i32, %c0_i32_0 : i32, i32
  }
  func.func @transform_6(%arg0: i32) -> (i32, i32) {
    %c0_i32 = arith.constant 0 : i32
    %c0_i32_0 = arith.constant 0 : i32
    %c0_i32_1 = arith.constant 0 : i32
    return %c0_i32, %c0_i32_0 : i32, i32
  }
  func.func @transform_7(%arg0: i32) -> (i32, i32) {
    %c0_i32 = arith.constant 0 : i32
    %c0_i32_0 = arith.constant 0 : i32
    return %arg0, %c0_i32 : i32, i32
  }
}

</mosaic_0001>

<bundles_post_ra>
// kernel: _linears_forward_impl.1
= control target key start
LH: loop header
LB: loop body
LE: loop exit
PB: predicated region body
PF: predicated region fallthrough
CT: control target
= control target key end

     0   :  { %12 = vsyncpa [#allocation3], 0  ;;  %s823_s0 = inlined_call_operand.vmem [shape: f32[8,128], index: 0, kind: input, shape index: {}]   ;;  %s824_s1 = inlined_call_operand.hbm [shape: bf16[128,128], index: 1, kind: input, shape index: {}]   ;;  %s825_s2 = inlined_call_operand.vmem [shape: f32[1,128], index: 2, kind: input, shape index: {}]   ;;  %s826_s3 = inlined_call_operand.hbm [shape: bf16[128,128], index: 3, kind: input, shape index: {}]   ;;  %s827_s4 = inlined_call_operand.vmem [shape: f32[1,128], index: 4, kind: input, shape index: {}]   ;;  %s828_s5 = inlined_call_operand.hbm [shape: bf16[128,128], index: 5, kind: input, shape index: {}]   ;;  %s829_s6 = inlined_call_operand.vmem [shape: f32[1,128], index: 6, kind: input, shape index: {}]   ;;  %s830_s7 = inlined_call_operand.hbm [shape: f32[8,128], index: 7, kind: output, shape index: {}]  }
   0x1   :  { %13 = vsyncpa [#allocation6], 0 }
   0x2   :  { %14 = vsyncpa [#allocation4], 0  ;;  %s669_s24 = smov [#allocation5]   ;;  %s670_s26 = smov [#allocation2]  }
   0x3   :  { %s36_s25 = sshll.u32 %s669_s24, 4  ;;  %s22_s27 = sshll.u32 %s670_s26, 4  ;;  %s37_s25 = int_to_ptr.vmem [resolvable:$true] %s36_s25  ;;  %s717_s27 = int_to_ptr.vmem [resolvable:$true] %s22_s27 }
   0x4   :  { %s575_s30 = scalar_lea.hbm %s826_s3, 1024 }
   0x5   :  { %p576_p0 = scmp.ne.s32.totalorder %s826_s3, %s575_s30  ;;  %p579_p1 = scmp.lt.u32.totalorder %s575_s30, %s826_s3 }
   0x7   :  { %p581_p2 = pnand %p579_p1, %p576_p0 }
   0x9   :  { %584 = shalt.err (!%p581_p2)
}
   0xa   :  { %s585_s12 = scalar_lea.vmem %s37_s25, 1024  ;;  %p590_p4 = scmp.lt.s32.totalorder %s37_s25, %s37_s25 }
   0xb   :  { %p586_p3 = scmp.ne.s32.totalorder %s37_s25, %s585_s12  ;;  %p591_p5 = scmp.lt.s32.totalorder %s585_s12, %s585_s12 }
   0xd   :  { %p592_p6 = por %p591_p5, %p590_p4 }
   0xf   :  { %p593_p7 = pnand %p592_p6, %p586_p3 }
  0x11   :  { %596 = shalt.err (!%p593_p7)
}
  0x12   :  { %s671_s13 = smov 64   ;;  %s672_s14 = smov 4  }
  0x13   :  { %42 = dma.hbm_to_vmem [thread:$0]  %s826_s3, 1024, %s37_s25, [#allocation6], %s671_s13, %s671_s13, %s672_s14  }
  0x14   :  { %s597_s19 = scalar_lea.hbm %s824_s1, 1024 }
  0x15   :  { %p598_p8 = scmp.ne.s32.totalorder %s824_s1, %s597_s19  ;;  %p601_p9 = scmp.lt.u32.totalorder %s597_s19, %s824_s1 }
  0x17   :  { %p603_p10 = pnand %p601_p9, %p598_p8 }
  0x19   :  { %606 = shalt.err (!%p603_p10)
}
  0x1a   :  { %s607_s24 = scalar_lea.vmem %s717_s27, 1024  ;;  %p612_p12 = scmp.lt.s32.totalorder %s717_s27, %s717_s27 }
  0x1b   :  { %p608_p11 = scmp.ne.s32.totalorder %s717_s27, %s607_s24  ;;  %p613_p13 = scmp.lt.s32.totalorder %s607_s24, %s607_s24 }
  0x1d   :  { %p614_p0 = por %p613_p13, %p612_p12 }
  0x1f   :  { %p615_p1 = pnand %p614_p0, %p608_p11 }
  0x21   :  { %618 = shalt.err (!%p615_p1)
}
  0x22   :  { %28 = dma.hbm_to_vmem [thread:$0]  %s824_s1, 1024, %s717_s27, [#allocation3], %s671_s13, %s671_s13, %s672_s14  }
  0x23   :  { %s673_s26 = smov [#allocation7]   ;;  %s619_s8 = scalar_lea.hbm %s828_s5, 1024 }
  0x24   :  { %s50_s28 = sshll.u32 %s673_s26, 4  ;;  %p620_p2 = scmp.ne.s32.totalorder %s828_s5, %s619_s8  ;;  %s51_s28 = int_to_ptr.vmem [resolvable:$true] %s50_s28 }
  0x25   :  { %p623_p3 = scmp.lt.u32.totalorder %s619_s8, %s828_s5 }
  0x27   :  { %p625_p4 = pnand %p623_p3, %p620_p2 }
  0x29   :  { %628 = shalt.err (!%p625_p4)
}
  0x2a   :  { %s629_s15 = scalar_lea.vmem %s51_s28, 1024  ;;  %p634_p6 = scmp.lt.s32.totalorder %s51_s28, %s51_s28 }
  0x2b   :  { %p630_p5 = scmp.ne.s32.totalorder %s51_s28, %s629_s15  ;;  %p635_p7 = scmp.lt.s32.totalorder %s629_s15, %s629_s15 }
  0x2d   :  { %p636_p8 = por %p635_p7, %p634_p6 }
  0x2f   :  { %p637_p9 = pnand %p636_p8, %p630_p5 }
  0x31   :  { %640 = shalt.err (!%p637_p9)
}
  0x32   :  { %56 = dma.hbm_to_vmem [thread:$0]  %s828_s5, 1024, %s51_s28, [#allocation6], %s671_s13, %s671_s13, %s672_s14  }
  0x33   :  { %663 = dma.done.wait [#allocation3], 1024  }
  0x34   :  { %664 = vsyncadd [#allocation3], 4294966272 }
  0x35   :  { %665 = dma.done.wait [#allocation6], 2048  }
  0x36   :  { %666 = vsyncadd [#allocation6], 4294965248  ;;  %v674_v0 = vmov 0.0   ;;  %vm675_vm0 = vmmov 0   ;;  %v547_v1 = vld [vmem:[#allocation2] sm:$0xff]   ;;  %v548_v2 = vld [vmem:[#allocation2 + $0x8] sm:$0xff]  }
  0x37   :  { %479 = vmatprep.subr.bf16.mxu0 %v674_v0  ;;  %495 = vmatprep.mubr.msk.bf16.mxu0 %vm675_vm0, %v674_v0  ;;  %v549_v3 = vld [vmem:[#allocation2 + $0x10] sm:$0xff]   ;;  %v555_v4 = vld [vmem:[#allocation5] sm:$0xff]   ;;  %v550_v5 = vld [vmem:[#allocation2 + $0x18] sm:$0xff]   ;;  %s676_s19 = smov [#allocation8]  }
  0x38   :  { %499 = vmatprep.subr.bf16.mxu1 %v674_v0  ;;  %515 = vmatprep.mubr.msk.bf16.mxu1 %vm675_vm0, %v674_v0  ;;  %v556_v6 = vld [vmem:[#allocation5 + $0x8] sm:$0xff]   ;;  %v551_v7 = vld [vmem:[#allocation2 + $0x20] sm:$0xff]   ;;  %v557_v8 = vld [vmem:[#allocation5 + $0x10] sm:$0xff]   ;;  %s415_s20 = sshll.u32 %s676_s19, 4  ;;  %s416_s20 = int_to_ptr.vmem [resolvable:$true] %s415_s20 }
  0x39   :  { %480 = vmatpush3.bf16.msra.mxu0 %v547_v1  ;;  %500 = vmatpush3.bf16.msra.mxu1 %v555_v4  ;;  %v552_v9 = vld [vmem:[#allocation2 + $0x28] sm:$0xff]   ;;  %v558_v10 = vld [vmem:[#allocation5 + $0x18] sm:$0xff]   ;;  %v553_v11 = vld [vmem:[#allocation2 + $0x30] sm:$0xff]   ;;  %p646_p11 = scmp.lt.s32.totalorder %s416_s20, %s416_s20 }
  0x3a   :  { %481 = vmatprep.subr.bf16.mxu0 %v674_v0  ;;  %501 = vmatprep.subr.bf16.mxu1 %v674_v0  ;;  %v554_v12 = vld [vmem:[#allocation2 + $0x38] sm:$0xff]   ;;  %v69_v13 = vld [vmem:[%s823_s0] sm:$0xff]  ;;  %v560_v16 = vld [vmem:[#allocation5 + $0x28] sm:$0xff]  }
  0x3b   :  { %v87_v14 = vpack.c.bf16 %v69_v13, %v69_v13  ;;  %v559_v15 = vld [vmem:[#allocation5 + $0x20] sm:$0xff]   ;;  %v561_v17 = vld [vmem:[#allocation5 + $0x30] sm:$0xff]   ;;  %v562_v18 = vld [vmem:[#allocation5 + $0x38] sm:$0xff]  }
  0x3c   :  { %v563_v19 = vld [vmem:[#allocation7] sm:$0xff]   ;;  %v564_v20 = vld [vmem:[#allocation7 + $0x8] sm:$0xff]   ;;  %v565_v21 = vld [vmem:[#allocation7 + $0x10] sm:$0xff]  }
  0x3d   :  { %482 = vmatpush3.bf16.msra.mxu0 %v548_v2  ;;  %502 = vmatpush3.bf16.msra.mxu1 %v556_v6  ;;  %v566_v22 = vld [vmem:[#allocation7 + $0x18] sm:$0xff]   ;;  %v425_v23 = vld [vmem:[%s825_s2] ss:$0 sm:$0xff]  ;;  %v568_v32 = vld [vmem:[#allocation7 + $0x28] sm:$0xff]  }
  0x3e   :  { %483 = vmatprep.subr.bf16.mxu0 %v674_v0  ;;  %503 = vmatprep.subr.bf16.mxu1 %v674_v0  ;;  %v567_v31 = vld [vmem:[#allocation7 + $0x20] sm:$0xff]   ;;  %v569_v33 = vld [vmem:[#allocation7 + $0x30] sm:$0xff]   ;;  %v570_v34 = vld [vmem:[#allocation7 + $0x38] sm:$0xff]  }
  0x3f   :  { %v434_v35 = vld [vmem:[%s827_s4] ss:$0 sm:$0xff]  ;;  %s641_s4 = scalar_lea.vmem %s416_s20, 128 }
  0x40   :  { %v443_v43 = vld [vmem:[%s829_s6] ss:$0 sm:$0xff]  ;;  %p642_p10 = scmp.ne.s32.totalorder %s416_s20, %s641_s4  ;;  %p647_p12 = scmp.lt.s32.totalorder %s641_s4, %s641_s4 }
  0x41   :  { %484 = vmatpush3.bf16.msra.mxu0 %v549_v3  ;;  %504 = vmatpush3.bf16.msra.mxu1 %v557_v8 }
  0x42   :  { %485 = vmatprep.subr.bf16.mxu0 %v674_v0  ;;  %505 = vmatprep.subr.bf16.mxu1 %v674_v0  ;;  %p648_p13 = por %p647_p12, %p646_p11 }
  0x44   :  { %p649_p0 = pnand %p648_p13, %p642_p10 }
  0x45   :  { %486 = vmatpush3.bf16.msra.mxu0 %v550_v5  ;;  %506 = vmatpush3.bf16.msra.mxu1 %v558_v10 }
  0x46   :  { %487 = vmatprep.subr.bf16.mxu0 %v674_v0  ;;  %507 = vmatprep.subr.bf16.mxu1 %v674_v0 }
  0x49   :  { %488 = vmatpush3.bf16.msra.mxu0 %v551_v7  ;;  %508 = vmatpush3.bf16.msra.mxu1 %v559_v15 }
  0x4a   :  { %489 = vmatprep.subr.bf16.mxu0 %v674_v0  ;;  %509 = vmatprep.subr.bf16.mxu1 %v674_v0 }
  0x4d   :  { %490 = vmatpush3.bf16.msra.mxu0 %v552_v9  ;;  %510 = vmatpush3.bf16.msra.mxu1 %v560_v16 }
  0x4e   :  { %491 = vmatprep.subr.bf16.mxu0 %v674_v0  ;;  %511 = vmatprep.subr.bf16.mxu1 %v674_v0 }
  0x51   :  { %492 = vmatpush3.bf16.msra.mxu0 %v553_v11  ;;  %512 = vmatpush3.bf16.msra.mxu1 %v561_v17 }
  0x52   :  { %493 = vmatprep.subr.bf16.mxu0 %v674_v0  ;;  %513 = vmatprep.subr.bf16.mxu1 %v674_v0 }
  0x55   :  { %494 = vmatpush3.bf16.msra.mxu0 %v554_v12  ;;  %514 = vmatpush3.bf16.msra.mxu1 %v562_v18 }
  0x56   :  { %519 = vmatprep.subr.bf16.mxu0 %v674_v0 }
  0x58   :  { %496 = vmatmul.mubr.bf16.vlgmr.msra.gmra.mrb[0].mxu0 %v87_v14 }
  0x59   :  { %535 = vmatprep.mubr.msk.bf16.mxu0 %vm675_vm0, %v674_v0  ;;  %520 = vmatpush3.bf16.msra.mxu0 %v563_v19 }
  0x5a   :  { %521 = vmatprep.subr.bf16.mxu0 %v674_v0 }
  0x5d   :  { %522 = vmatpush3.bf16.msra.mxu0 %v564_v20 }
  0x5e   :  { %523 = vmatprep.subr.bf16.mxu0 %v674_v0 }
  0x61   :  { %524 = vmatpush3.bf16.msra.mxu0 %v565_v21 }
  0x62   :  { %525 = vmatprep.subr.bf16.mxu0 %v674_v0 }
  0x65   :  { %526 = vmatpush3.bf16.msra.mxu0 %v566_v22 }
  0x66   :  { %527 = vmatprep.subr.bf16.mxu0 %v674_v0 }
  0x69   :  { %528 = vmatpush3.bf16.msra.mxu0 %v567_v31 }
  0x6a   :  { %529 = vmatprep.subr.bf16.mxu0 %v674_v0 }
  0x6d   :  { %530 = vmatpush3.bf16.msra.mxu0 %v568_v32 }
  0x6e   :  { %531 = vmatprep.subr.bf16.mxu0 %v674_v0 }
  0x71   :  { %532 = vmatpush3.bf16.msra.mxu0 %v569_v33 }
  0x72   :  { %533 = vmatprep.subr.bf16.mxu0 %v674_v0 }
  0x75   :  { %534 = vmatpush3.bf16.msra.mxu0 %v570_v34 }
 0x12b   :  { %v176_v24 = vpop.f32.mrb[0].mxu0 }
 0x12c   :  { %v177_v25 = vadd.f32 %v425_v23, %v176_v24  ;;  %v497_v26 = vpop.f32.mrb[1].mxu0 }
 0x12d   :  { %v179_v27 = vpop.f32.mrb[2].mxu0 }
 0x12e   :  { %571 = vtanh.f32 %v177_v25  ;;  %v498_v28 = vpop.f32.mrb[3].mxu0 }
 0x138   :  { %v572_v29 = vpop.eup %571 }
 0x139   :  { %v200_v30 = vpack.c.bf16 %v572_v29, %v572_v29 }
 0x13b   :  { %516 = vmatmul.mubr.bf16.vlgmr.msra.gmra.mrb[0].mxu1 %v200_v30 }
 0x20e   :  { %v289_v36 = vpop.f32.mrb[0].mxu1 }
 0x20f   :  { %v290_v37 = vadd.f32 %v434_v35, %v289_v36  ;;  %v517_v38 = vpop.f32.mrb[1].mxu1 }
 0x210   :  { %v292_v39 = vpop.f32.mrb[2].mxu1 }
 0x211   :  { %573 = vtanh.f32 %v290_v37  ;;  %v518_v40 = vpop.f32.mrb[3].mxu1 }
 0x21b   :  { %v574_v41 = vpop.eup %573 }
 0x21c   :  { %v313_v42 = vpack.c.bf16 %v574_v41, %v574_v41 }
 0x21e   :  { %536 = vmatmul.mubr.bf16.vlgmr.msra.gmra.mrb[4].mxu0 %v313_v42 }
 0x2f1   :  { %v402_v44 = vpop.f32.mrb[4].mxu0 }
 0x2f2   :  { %v403_v45 = vadd.f32 %v443_v43, %v402_v44  ;;  %v537_v46 = vpop.f32.mrb[5].mxu0 }
 0x2f3   :  { %v405_v47 = vpop.f32.mrb[6].mxu0 }
 0x2f4   :  { %408 = vst [vmem:[#allocation8] sm:$0xff] %v403_v45  ;;  %v538_v48 = vpop.f32.mrb[7].mxu0 }
 0x2f5   :  { %652 = shalt.err (!%p649_p0)
}
 0x2f6   :  { %s653_s6 = scalar_lea.hbm %s830_s7, 128 }
 0x2f7   :  { %p654_p1 = scmp.ne.s32.totalorder %s830_s7, %s653_s6  ;;  %p657_p2 = scmp.lt.u32.totalorder %s653_s6, %s830_s7 }
 0x2f9   :  { %p659_p3 = pnand %p657_p2, %p654_p1 }
 0x2fb   :  { %662 = shalt.err (!%p659_p3)
}
 0x2fc   :  { %418 = dma.vmem_to_hbm [thread:$0]  %s416_s20, 128, %s830_s7, [#allocation4]  }
 0x2fd   :  { %667 = dma.done.wait [#allocation4], 128  }
 0x2fe   :  { %668 = vsyncadd [#allocation4], 4294967168 }
 0x2ff   :  { %422 = vsyncpa [#allocation3], 1 }
 0x300   :  { %423 = vsyncpa [#allocation6], 1 }
 0x301   :  { %424 = vsyncpa [#allocation4], 1 }

</bundles_post_ra>
